<compile_context>
chip_gen: v5e
topology: v5e:2x2
jax: 0.10.0
libtpu: 0.0.40
codegen_flags: <defaults>
</compile_context>

<pallas_src>
import functools
import math

import jax
import jax.numpy as jnp
from jax.experimental import pallas as pl
from jax.experimental.pallas import tpu as pltpu


def _build_pe(d_model: int, max_len: int = 5000) -> jnp.ndarray:
    """Deterministic parameter setup (mirrors PositionalEncodingLayer.__init__)."""
    position = jnp.arange(max_len, dtype=jnp.float32)[:, None]            # (L, 1)
    div_term = jnp.exp(
        jnp.arange(0, d_model, 2, dtype=jnp.float32) * (-math.log(10000.0) / d_model)
    )                                                                     # (D/2,)
    pe = jnp.zeros((max_len, d_model), dtype=jnp.float32)
    pe = pe.at[:, 0::2].set(jnp.sin(position * div_term))
    pe = pe.at[:, 1::2].set(jnp.cos(position * div_term))
    return pe[:, None, :]                                                 # (L, 1, D)


def _pe_add_kernel(x_ref, pe_ref, o_ref, *, batch: int, d_model: int):
    """x_ref/o_ref: (ts, B*D) lane-dense blocks.  pe_ref: (ts, D).

    The batch broadcast is done with static lane slices (equivalent to
    jnp.tile(pe_ref[...], (1, batch))).  For production d_model >= 128 every
    slice store is a full-lane unmasked vst, and the HBM writeback is one
    dense (ts, B*D) DMA either way.
    """
    pe_row = pe_ref[...]                       # (ts, D)
    x_all = x_ref[...]                         # (ts, B*D)
    for b in range(batch):                     # static, unrolled (small B)
        lo = b * d_model
        o_ref[:, lo:lo + d_model] = (
            x_all[:, lo:lo + d_model] + pe_row
        ).astype(o_ref.dtype)


def _choose_seq_tile(S: int, row_bytes: int, tile_budget_bytes: int = 4 << 20) -> int:
    """Pick the sequence-tile size.

    - one block <= ~4 MiB so the double-buffered in+out working set stays well
      inside v7x's 64 MiB physical / 32 MiB scoped VMEM (and v5e's 16 MiB
      scoped default),
    - prefer several grid steps so v7x's two TensorCores both get work and the
      auto-pipeline has DMA/compute to overlap,
    - keep the tile a multiple of 8 sublanes unless it covers the whole axis.
    """
    ts = max(1, tile_budget_bytes // max(row_bytes, 1))
    if S >= 64:
        ts = min(ts, max(8, S // 8))
    elif S >= 16:
        ts = min(ts, max(8, S // 2))
    ts = min(ts, S)
    if ts < S:
        ts = max(8, (ts // 8) * 8)
    return ts


def positional_encoding_forward(x: jnp.ndarray, pe_full: jnp.ndarray) -> jnp.ndarray:
    """Equivalent of forward(x) = x + pe[:x.size(0), :]."""
    S, B, D = x.shape
    BD = B * D

    # Pre-cast pe to x.dtype (avoids f32 promotion / doubled vreg traffic when
    # x is bf16) and drop the broadcast axis: (S, 1, D) -> (S, D).
    pe = pe_full[:S, 0, :].astype(x.dtype)
    # Lane-dense layout: fold batch into the lane axis.  Free (contiguous)
    # view for the row-major (S, B, D) layout; undone after the call.
    x2 = x.reshape(S, BD)

    itemsize = jnp.dtype(x.dtype).itemsize
    ts = _choose_seq_tile(S, BD * itemsize)
    # Partial last block (S % ts) is handled by Pallas boundary padding; safe
    # for an elementwise add (out-of-bounds rows are never written back).
    grid = (pl.cdiv(S, ts),)

    # Explicit VMEM budget: double-buffered x + out blocks plus the pe block.
    tile_bytes = ts * (2 * BD + D) * itemsize
    vmem_limit = int(min(64 << 20, max(8 << 20, 4 * tile_bytes)))

    kernel = functools.partial(_pe_add_kernel, batch=B, d_model=D)

    out2 = pl.pallas_call(
        kernel,
        out_shape=jax.ShapeDtypeStruct((S, BD), x.dtype),
        grid=grid,
        in_specs=[
            pl.BlockSpec((ts, BD), lambda i: (i, 0)),
            pl.BlockSpec((ts, D), lambda i: (i, 0)),
        ],
        out_specs=pl.BlockSpec((ts, BD), lambda i: (i, 0)),
        compiler_params=pltpu.CompilerParams(
            dimension_semantics=("parallel",),   # shard seq tiles across v7x's 2 TCs
            vmem_limit_bytes=vmem_limit,
        ),
        # TODO(synk): consider input_output_aliases={0: 0} (in-place add into
        # x's buffer) and fusing adjacent elementwise ops (embedding scale,
        # dropout) once embedded in a full transformer block.
    )(x2, pe)
    return out2.reshape(S, B, D)


if __name__ == "__main__":
    d_model = 32
    max_len = 64          # small max_len; semantics identical to 5000 for S <= 64
    seq = 8
    batch = 2

    key = jax.random.PRNGKey(0)
    x = jax.random.normal(key, (seq, batch, d_model), dtype=jnp.float32)

    pe_full = _build_pe(d_model, max_len)

    out = positional_encoding_forward(x, pe_full)
    out = jax.block_until_ready(out)

    # Reference check (plain JAX)
    ref = x + pe_full[:seq]
    assert out.shape == x.shape
    assert jnp.allclose(out, ref, atol=1e-6, rtol=1e-6)

    print("KERNEL_OK")
</pallas_src>

<mosaic_0001>
module attributes {stable_mosaic.version = 11 : i64} {
  func.func @_pe_add_kernel(%arg0: i32, %arg1: memref<8x64xf32, #tpu.memory_space<vmem>>, %arg2: memref<8x32xf32, #tpu.memory_space<vmem>>, %arg3: memref<8x64xf32, #tpu.memory_space<vmem>>) attributes {dimension_semantics = [#tpu.dimension_semantics<parallel>], iteration_bounds = array<i64: 1>, scalar_prefetch = 0 : i64, scratch_operands = 0 : i64, tpu.core_type = #tpu.core_type<tc>, window_params = [{transform_indices = @transform_0, window_bounds = array<i64: 8, 64>}, {transform_indices = @transform_1, window_bounds = array<i64: 8, 32>}, {transform_indices = @transform_2, window_bounds = array<i64: 8, 64>}]} {
    %c0 = arith.constant 0 : index
    %c0_0 = arith.constant 0 : index
    %0 = vector.load %arg2[%c0, %c0_0] : memref<8x32xf32, #tpu.memory_space<vmem>>, vector<8x32xf32>
    %c0_1 = arith.constant 0 : index
    %c0_2 = arith.constant 0 : index
    %1 = vector.load %arg1[%c0_1, %c0_2] : memref<8x64xf32, #tpu.memory_space<vmem>>, vector<8x64xf32>
    %2 = vector.extract_strided_slice %1 {offsets = [0, 0], sizes = [8, 32], strides = [1, 1]} : vector<8x64xf32> to vector<8x32xf32>
    %3 = arith.addf %2, %0 : vector<8x32xf32>
    %c0_3 = arith.constant 0 : index
    %c0_4 = arith.constant 0 : index
    %4 = vector.load %arg3[%c0_3, %c0_4] : memref<8x64xf32, #tpu.memory_space<vmem>>, vector<8x32xf32>
    tpu.vector_store %arg3[%c0_3, %c0_4], %3 {strides = array<i32>} : memref<8x64xf32, #tpu.memory_space<vmem>>, vector<8x32xf32>,
    %5 = vector.extract_strided_slice %1 {offsets = [0, 32], sizes = [8, 32], strides = [1, 1]} : vector<8x64xf32> to vector<8x32xf32>
    %6 = arith.addf %5, %0 : vector<8x32xf32>
    %c0_5 = arith.constant 0 : index
    %c32 = arith.constant 32 : index
    %7 = vector.load %arg3[%c0_5, %c32] : memref<8x64xf32, #tpu.memory_space<vmem>>, vector<8x32xf32>
    tpu.vector_store %arg3[%c0_5, %c32], %6 {strides = array<i32>} : memref<8x64xf32, #tpu.memory_space<vmem>>, vector<8x32xf32>,
    return
  }
  func.func @transform_0(%arg0: i32) -> (i32, i32) {
    %c0_i32 = arith.constant 0 : i32
    %c0_i32_0 = arith.constant 0 : i32
    return %arg0, %c0_i32 : i32, i32
  }
  func.func @transform_1(%arg0: i32) -> (i32, i32) {
    %c0_i32 = arith.constant 0 : i32
    %c0_i32_0 = arith.constant 0 : i32
    return %arg0, %c0_i32 : i32, i32
  }
  func.func @transform_2(%arg0: i32) -> (i32, i32) {
    %c0_i32 = arith.constant 0 : i32
    %c0_i32_0 = arith.constant 0 : i32
    return %arg0, %c0_i32 : i32, i32
  }
}

</mosaic_0001>

<bundles_post_ra>
// kernel: tpu_custom_call.1
= control target key start
LH: loop header
LB: loop body
LE: loop exit
PB: predicated region body
PF: predicated region fallthrough
CT: control target
= control target key end

     0   :  { %7 = vsyncpa [#allocation3], 0  ;;  %s180_s0 = inlined_call_operand.hbm [shape: f32[8,64], index: 0, kind: input, shape index: {}]   ;;  %s181_s1 = inlined_call_operand.hbm [shape: f32[8,32], index: 1, kind: input, shape index: {}]   ;;  %s182_s2 = inlined_call_operand.hbm [shape: f32[8,64], index: 2, kind: output, shape index: {}]  }
   0x1   :  { %8 = vsyncpa [#allocation6], 0 }
   0x2   :  { %9 = vsyncpa [#allocation4], 0  ;;  %s15_s11 = sshll.u32 %s180_s0, 4  ;;  %s152_s12 = smov [#allocation2]   ;;  %s16_s11 = int_to_ptr.hbm [resolvable:$true] %s15_s11 }
   0x3   :  { %s17_s13 = sshll.u32 %s152_s12, 4  ;;  %s26_s16 = sshll.u32 %s181_s1, 4  ;;  %s18_s13 = int_to_ptr.vmem [resolvable:$true] %s17_s13  ;;  %s27_s16 = int_to_ptr.hbm [resolvable:$true] %s26_s16 }
   0x4   :  { %20 = dma.hbm_to_vmem [thread:$0]  %s16_s11, 128, %s18_s13, [#allocation3]  }
   0x5   :  { %s153_s17 = smov [#allocation5]  }
   0x6   :  { %s28_s18 = sshll.u32 %s153_s17, 4  ;;  %s29_s18 = int_to_ptr.vmem [resolvable:$true] %s28_s18 }
   0x7   :  { %31 = dma.hbm_to_vmem [thread:$0]  %s27_s16, 128, %s29_s18, [#allocation6]  }
   0x8   :  { %146 = dma.done.wait [#allocation3], 128  }
   0x9   :  { %147 = vsyncadd [#allocation3], 4294967168 }
   0xa   :  { %148 = dma.done.wait [#allocation6], 128  }
   0xb   :  { %149 = vsyncadd [#allocation6], 4294967168  ;;  %v40_v0 = vld [vmem:[#allocation5] sm:$0xff]  ;;  %v41_v1 = vld [vmem:[#allocation2] sm:$0xff]  ;;  %vm43_vm0 = vcmask 261120   ;;  %s154_s0 = smov 32  }
   0xc   :  { %v42_v2 = vadd.f32 %v41_v1, %v40_v0  ;;  %46 = vrot.lane.b32.xlu0 %v40_v0, %s154_s0  ;;  %s155_s19 = smov [#allocation7]   ;;  %s59_s22 = sshll.u32 %s182_s2, 4  ;;  %vm50_vm1 = vcmask 523520   ;;  %s60_s22 = int_to_ptr.hbm [resolvable:$true] %s59_s22 }
   0xd   :  { %s57_s20 = sshll.u32 %s155_s19, 4  ;;  %s58_s20 = int_to_ptr.vmem [resolvable:$true] %s57_s20 }
   0xe   :  { %44 = vst.msk [vmem:[#allocation7] sm:$0xff] %vm43_vm0, %v42_v2 }
  0x7e   :  { %v47_v3 = vpop.permute.xlu0 %46 }
  0x7f   :  { %v49_v4 = vadd.f32 %v47_v3, %v41_v1 }
  0x81   :  { %51 = vst.msk [vmem:[#allocation7] sm:$0xff] %vm50_vm1, %v49_v4 }
  0x82   :  { %62 = dma.vmem_to_hbm [thread:$0]  %s58_s20, 128, %s60_s22, [#allocation4]  }
  0x83   :  { %150 = dma.done.wait [#allocation4], 128  }
  0x84   :  { %151 = vsyncadd [#allocation4], 4294967168 }
  0x85   :  { %67 = vsyncpa [#allocation3], 1 }
  0x86   :  { %68 = vsyncpa [#allocation6], 1 }
  0x87   :  { %69 = vsyncpa [#allocation4], 1 }

</bundles_post_ra>
